<compile_context>
chip_gen: v7x
topology: tpu7x:2x2x1
jax: 0.10.0
libtpu: 0.0.40
codegen_flags: <defaults>
</compile_context>

<pallas_src>
import math

import jax
import jax.numpy as jnp
from jax.experimental import pallas as pl
from jax.experimental.pallas import tpu as pltpu


def _make_mlp_kernel(training: bool, noise_stddev: float):
    """Fused MLP kernel. `training` / `noise_stddev` are compile-time constants."""

    def kernel(seed_ref, w1_ref, b1_ref, w2_ref, b2_ref, w3_ref, b3_ref,
               x_ref, o_ref):
        # x_ref block: (2, TILE_R, C).  Feature index on the leading axis,
        # batch spread dense over sublanes (TILE_R) x lanes (C).
        x0 = x_ref[0]          # (TILE_R, C)  feature 0 for TILE_R*C batch rows
        x1 = x_ref[1]          # (TILE_R, C)  feature 1

        if training:
            # NoisyLinear adds N(0, stddev) noise to the *input* (matches torch).
            # Per-tile seed offset so every batch tile gets independent noise.
            pltpu.prng_seed(seed_ref[0] + pl.program_id(0))
            x0 = x0 + pltpu.stateful_normal(x0.shape, jnp.float32) * noise_stddev
            x1 = x1 + pltpu.stateful_normal(x1.shape, jnp.float32) * noise_stddev

        # Layer 1: NoisyLinear(2, 4) -> ReLU.  Scalar weights from SMEM, VPU only.
        # w1 flat layout: w1[i, j] -> w1_ref[4*i + j]   (i = in-feature, j = out)
        h1 = []
        for j in range(4):
            acc = w1_ref[j] * x0 + w1_ref[4 + j] * x1 + b1_ref[j]
            h1.append(jnp.maximum(acc, 0.0))

        # Layer 2: Linear(4, 4) -> ReLU.   w2[i, j] -> w2_ref[4*i + j]
        h2 = []
        for j in range(4):
            acc = h1[0] * w2_ref[j]
            for i in range(1, 4):
                acc = acc + h1[i] * w2_ref[4 * i + j]
            h2.append(jnp.maximum(acc + b2_ref[j], 0.0))

        # Layer 3: Linear(4, 1) -> Sigmoid.  w3[i, 0] -> w3_ref[i]
        acc = h2[0] * w3_ref[0]
        for i in range(1, 4):
            acc = acc + h2[i] * w3_ref[i]
        o_ref[...] = jax.nn.sigmoid(acc + b3_ref[0])

    return kernel


def my_noisy_module_forward(params, x, training=False, seed=0, noise_stddev=0.07,
                            lane_cols=512, max_tile_rows=256):
    """Pallas-fused forward of MyNoisyModule. x: (N, 2) float32 -> (N, 1) float32."""
    n = x.shape[0]
    C = lane_cols                                   # lane axis, multiple of 128

    # Number of sublane-rows needed to hold the batch at C rows-per-lane-row.
    r_needed = max(1, pl.cdiv(n, C))
    if r_needed <= max_tile_rows:
        tile_r = r_needed                           # single row-tile (== full dim)
        R = r_needed
    else:
        tile_r = max_tile_rows                      # multiple of 8
        R = pl.cdiv(r_needed, tile_r) * tile_r
    n_pad = R * C
    grid = (R // tile_r,)

    # Wrapper-side layout plumbing: (N, 2) -> (2, N_pad) -> (2, R, C).
    xt = jnp.transpose(x.astype(jnp.float32))                  # (2, n)
    xt = jnp.pad(xt, ((0, 0), (0, n_pad - n)))                 # (2, n_pad)
    x3 = xt.reshape(2, R, C)                                   # (2, R, C)

    # Weights / biases flattened to small 1-D f32 arrays living in SMEM.
    w1f = params["w1"].reshape(-1).astype(jnp.float32)         # (8,)
    b1f = params["b1"].reshape(-1).astype(jnp.float32)         # (4,)
    w2f = params["w2"].reshape(-1).astype(jnp.float32)         # (16,)
    b2f = params["b2"].reshape(-1).astype(jnp.float32)         # (4,)
    w3f = params["w3"].reshape(-1).astype(jnp.float32)         # (4,)
    b3f = params["b3"].reshape(-1).astype(jnp.float32)         # (1,)
    seed_arr = jnp.asarray([seed], dtype=jnp.int32)

    kernel = _make_mlp_kernel(training, noise_stddev)
    smem_spec = pl.BlockSpec(memory_space=pltpu.MemorySpace.SMEM)

    out = pl.pallas_call(
        kernel,
        out_shape=jax.ShapeDtypeStruct((R, C), jnp.float32),
        grid=grid,
        in_specs=[smem_spec] * 7
        + [pl.BlockSpec((2, tile_r, C), lambda i: (0, i, 0))],
        out_specs=pl.BlockSpec((tile_r, C), lambda i: (i, 0)),
        compiler_params=pltpu.CompilerParams(
            dimension_semantics=("parallel",)),
    )(seed_arr, w1f, b1f, w2f, b2f, w3f, b3f, x3)

    # (R, C) -> (n, 1), dropping the padded rows.
    return out.reshape(n_pad, 1)[:n]


def init_params(key):
    """Deterministic parameter init matching the PyTorch module's __init__ shapes."""
    k1, k2, k3, k4, k5 = jax.random.split(key, 5)

    # NoisyLinear(2, 4): w is (in, out), xavier_uniform; b is zeros.
    fan_in, fan_out = 2, 4
    bound1 = math.sqrt(6.0 / (fan_in + fan_out))
    w1 = jax.random.uniform(k1, (2, 4), jnp.float32, -bound1, bound1)
    b1 = jnp.zeros((4,), jnp.float32)

    # nn.Linear(4, 4): default init U(-1/sqrt(fan_in), 1/sqrt(fan_in)); stored (in, out).
    bound2 = 1.0 / math.sqrt(4.0)
    w2 = jax.random.uniform(k2, (4, 4), jnp.float32, -bound2, bound2)
    b2 = jax.random.uniform(k3, (4,), jnp.float32, -bound2, bound2)

    # nn.Linear(4, 1): stored (in, out).
    bound3 = 1.0 / math.sqrt(4.0)
    w3 = jax.random.uniform(k4, (4, 1), jnp.float32, -bound3, bound3)
    b3 = jax.random.uniform(k5, (1,), jnp.float32, -bound3, bound3)

    return {"w1": w1, "b1": b1, "w2": w2, "b2": b2, "w3": w3, "b3": b3}


if __name__ == "__main__":
    key = jax.random.PRNGKey(0)
    pkey, xkey = jax.random.split(key)

    params = init_params(pkey)

    # Same distribution/shape as the script's data: uniform(-1, 1), (200, 2).
    x = jax.random.uniform(xkey, (200, 2), jnp.float32, -1.0, 1.0)

    out = my_noisy_module_forward(params, x, training=False)
    out = jax.block_until_ready(out)

    assert out.shape == (200, 1) and out.dtype == jnp.float32
    assert bool(jnp.all((out >= 0.0) & (out <= 1.0)))  # sigmoid range sanity check
    assert bool(jnp.all(jnp.isfinite(out)))

    print("KERNEL_OK")
</pallas_src>

<mosaic_0001>
module attributes {stable_mosaic.version = 11 : i64} {
  func.func @kernel(%arg0: i32, %arg1: memref<1xi32, #tpu.memory_space<smem>>, %arg2: memref<8xf32, #tpu.memory_space<smem>>, %arg3: memref<4xf32, #tpu.memory_space<smem>>, %arg4: memref<16xf32, #tpu.memory_space<smem>>, %arg5: memref<4xf32, #tpu.memory_space<smem>>, %arg6: memref<4xf32, #tpu.memory_space<smem>>, %arg7: memref<1xf32, #tpu.memory_space<smem>>, %arg8: memref<2x1x512xf32, #tpu.memory_space<vmem>>, %arg9: memref<1x512xf32, #tpu.memory_space<vmem>>) attributes {dimension_semantics = [#tpu.dimension_semantics<parallel>], iteration_bounds = array<i64: 1>, scalar_prefetch = 0 : i64, scratch_operands = 0 : i64, tpu.core_type = #tpu.core_type<tc>, window_params = [{transform_indices = @transform_0, window_bounds = array<i64: 1>}, {transform_indices = @transform_1, window_bounds = array<i64: 8>}, {transform_indices = @transform_2, window_bounds = array<i64: 4>}, {transform_indices = @transform_3, window_bounds = array<i64: 16>}, {transform_indices = @transform_4, window_bounds = array<i64: 4>}, {transform_indices = @transform_5, window_bounds = array<i64: 4>}, {transform_indices = @transform_6, window_bounds = array<i64: 1>}, {transform_indices = @transform_7, window_bounds = array<i64: 2, 1, 512>}, {transform_indices = @transform_8, window_bounds = array<i64: 1, 512>}]} {
    %c0 = arith.constant 0 : index
    %c0_0 = arith.constant 0 : index
    %c0_1 = arith.constant 0 : index
    %0 = vector.load %arg8[%c0, %c0_0, %c0_1] : memref<2x1x512xf32, #tpu.memory_space<vmem>>, vector<1x1x512xf32>
    %1 = vector.shape_cast %0 : vector<1x1x512xf32> to vector<1x512xf32>
    %c1 = arith.constant 1 : index
    %c0_2 = arith.constant 0 : index
    %c0_3 = arith.constant 0 : index
    %2 = vector.load %arg8[%c1, %c0_2, %c0_3] : memref<2x1x512xf32, #tpu.memory_space<vmem>>, vector<1x1x512xf32>
    %3 = vector.shape_cast %2 : vector<1x1x512xf32> to vector<1x512xf32>
    %c0_4 = arith.constant 0 : index
    %4 = memref.load %arg2[%c0_4] : memref<8xf32, #tpu.memory_space<smem>>
    %5 = vector.broadcast %4 : f32 to vector<1x512xf32>
    %6 = arith.mulf %5, %1 : vector<1x512xf32>
    %c4 = arith.constant 4 : index
    %7 = memref.load %arg2[%c4] : memref<8xf32, #tpu.memory_space<smem>>
    %8 = vector.broadcast %7 : f32 to vector<1x512xf32>
    %9 = arith.mulf %8, %3 : vector<1x512xf32>
    %10 = arith.addf %6, %9 : vector<1x512xf32>
    %c0_5 = arith.constant 0 : index
    %11 = memref.load %arg3[%c0_5] : memref<4xf32, #tpu.memory_space<smem>>
    %12 = vector.broadcast %11 : f32 to vector<1x512xf32>
    %13 = arith.addf %10, %12 : vector<1x512xf32>
    %cst = arith.constant 0.000000e+00 : f32
    %14 = vector.broadcast %cst : f32 to vector<1x512xf32>
    %15 = arith.maximumf %13, %14 : vector<1x512xf32>
    %c1_6 = arith.constant 1 : index
    %16 = memref.load %arg2[%c1_6] : memref<8xf32, #tpu.memory_space<smem>>
    %17 = vector.broadcast %16 : f32 to vector<1x512xf32>
    %18 = arith.mulf %17, %1 : vector<1x512xf32>
    %c5 = arith.constant 5 : index
    %19 = memref.load %arg2[%c5] : memref<8xf32, #tpu.memory_space<smem>>
    %20 = vector.broadcast %19 : f32 to vector<1x512xf32>
    %21 = arith.mulf %20, %3 : vector<1x512xf32>
    %22 = arith.addf %18, %21 : vector<1x512xf32>
    %c1_7 = arith.constant 1 : index
    %23 = memref.load %arg3[%c1_7] : memref<4xf32, #tpu.memory_space<smem>>
    %24 = vector.broadcast %23 : f32 to vector<1x512xf32>
    %25 = arith.addf %22, %24 : vector<1x512xf32>
    %cst_8 = arith.constant 0.000000e+00 : f32
    %26 = vector.broadcast %cst_8 : f32 to vector<1x512xf32>
    %27 = arith.maximumf %25, %26 : vector<1x512xf32>
    %c2 = arith.constant 2 : index
    %28 = memref.load %arg2[%c2] : memref<8xf32, #tpu.memory_space<smem>>
    %29 = vector.broadcast %28 : f32 to vector<1x512xf32>
    %30 = arith.mulf %29, %1 : vector<1x512xf32>
    %c6 = arith.constant 6 : index
    %31 = memref.load %arg2[%c6] : memref<8xf32, #tpu.memory_space<smem>>
    %32 = vector.broadcast %31 : f32 to vector<1x512xf32>
    %33 = arith.mulf %32, %3 : vector<1x512xf32>
    %34 = arith.addf %30, %33 : vector<1x512xf32>
    %c2_9 = arith.constant 2 : index
    %35 = memref.load %arg3[%c2_9] : memref<4xf32, #tpu.memory_space<smem>>
    %36 = vector.broadcast %35 : f32 to vector<1x512xf32>
    %37 = arith.addf %34, %36 : vector<1x512xf32>
    %cst_10 = arith.constant 0.000000e+00 : f32
    %38 = vector.broadcast %cst_10 : f32 to vector<1x512xf32>
    %39 = arith.maximumf %37, %38 : vector<1x512xf32>
    %c3 = arith.constant 3 : index
    %40 = memref.load %arg2[%c3] : memref<8xf32, #tpu.memory_space<smem>>
    %41 = vector.broadcast %40 : f32 to vector<1x512xf32>
    %42 = arith.mulf %41, %1 : vector<1x512xf32>
    %c7 = arith.constant 7 : index
    %43 = memref.load %arg2[%c7] : memref<8xf32, #tpu.memory_space<smem>>
    %44 = vector.broadcast %43 : f32 to vector<1x512xf32>
    %45 = arith.mulf %44, %3 : vector<1x512xf32>
    %46 = arith.addf %42, %45 : vector<1x512xf32>
    %c3_11 = arith.constant 3 : index
    %47 = memref.load %arg3[%c3_11] : memref<4xf32, #tpu.memory_space<smem>>
    %48 = vector.broadcast %47 : f32 to vector<1x512xf32>
    %49 = arith.addf %46, %48 : vector<1x512xf32>
    %cst_12 = arith.constant 0.000000e+00 : f32
    %50 = vector.broadcast %cst_12 : f32 to vector<1x512xf32>
    %51 = arith.maximumf %49, %50 : vector<1x512xf32>
    %c0_13 = arith.constant 0 : index
    %52 = memref.load %arg4[%c0_13] : memref<16xf32, #tpu.memory_space<smem>>
    %53 = vector.broadcast %52 : f32 to vector<1x512xf32>
    %54 = arith.mulf %15, %53 : vector<1x512xf32>
    %c4_14 = arith.constant 4 : index
    %55 = memref.load %arg4[%c4_14] : memref<16xf32, #tpu.memory_space<smem>>
    %56 = vector.broadcast %55 : f32 to vector<1x512xf32>
    %57 = arith.mulf %27, %56 : vector<1x512xf32>
    %58 = arith.addf %54, %57 : vector<1x512xf32>
    %c8 = arith.constant 8 : index
    %59 = memref.load %arg4[%c8] : memref<16xf32, #tpu.memory_space<smem>>
    %60 = vector.broadcast %59 : f32 to vector<1x512xf32>
    %61 = arith.mulf %39, %60 : vector<1x512xf32>
    %62 = arith.addf %58, %61 : vector<1x512xf32>
    %c12 = arith.constant 12 : index
    %63 = memref.load %arg4[%c12] : memref<16xf32, #tpu.memory_space<smem>>
    %64 = vector.broadcast %63 : f32 to vector<1x512xf32>
    %65 = arith.mulf %51, %64 : vector<1x512xf32>
    %66 = arith.addf %62, %65 : vector<1x512xf32>
    %c0_15 = arith.constant 0 : index
    %67 = memref.load %arg5[%c0_15] : memref<4xf32, #tpu.memory_space<smem>>
    %68 = vector.broadcast %67 : f32 to vector<1x512xf32>
    %69 = arith.addf %66, %68 : vector<1x512xf32>
    %cst_16 = arith.constant 0.000000e+00 : f32
    %70 = vector.broadcast %cst_16 : f32 to vector<1x512xf32>
    %71 = arith.maximumf %69, %70 : vector<1x512xf32>
    %c1_17 = arith.constant 1 : index
    %72 = memref.load %arg4[%c1_17] : memref<16xf32, #tpu.memory_space<smem>>
    %73 = vector.broadcast %72 : f32 to vector<1x512xf32>
    %74 = arith.mulf %15, %73 : vector<1x512xf32>
    %c5_18 = arith.constant 5 : index
    %75 = memref.load %arg4[%c5_18] : memref<16xf32, #tpu.memory_space<smem>>
    %76 = vector.broadcast %75 : f32 to vector<1x512xf32>
    %77 = arith.mulf %27, %76 : vector<1x512xf32>
    %78 = arith.addf %74, %77 : vector<1x512xf32>
    %c9 = arith.constant 9 : index
    %79 = memref.load %arg4[%c9] : memref<16xf32, #tpu.memory_space<smem>>
    %80 = vector.broadcast %79 : f32 to vector<1x512xf32>
    %81 = arith.mulf %39, %80 : vector<1x512xf32>
    %82 = arith.addf %78, %81 : vector<1x512xf32>
    %c13 = arith.constant 13 : index
    %83 = memref.load %arg4[%c13] : memref<16xf32, #tpu.memory_space<smem>>
    %84 = vector.broadcast %83 : f32 to vector<1x512xf32>
    %85 = arith.mulf %51, %84 : vector<1x512xf32>
    %86 = arith.addf %82, %85 : vector<1x512xf32>
    %c1_19 = arith.constant 1 : index
    %87 = memref.load %arg5[%c1_19] : memref<4xf32, #tpu.memory_space<smem>>
    %88 = vector.broadcast %87 : f32 to vector<1x512xf32>
    %89 = arith.addf %86, %88 : vector<1x512xf32>
    %cst_20 = arith.constant 0.000000e+00 : f32
    %90 = vector.broadcast %cst_20 : f32 to vector<1x512xf32>
    %91 = arith.maximumf %89, %90 : vector<1x512xf32>
    %c2_21 = arith.constant 2 : index
    %92 = memref.load %arg4[%c2_21] : memref<16xf32, #tpu.memory_space<smem>>
    %93 = vector.broadcast %92 : f32 to vector<1x512xf32>
    %94 = arith.mulf %15, %93 : vector<1x512xf32>
    %c6_22 = arith.constant 6 : index
    %95 = memref.load %arg4[%c6_22] : memref<16xf32, #tpu.memory_space<smem>>
    %96 = vector.broadcast %95 : f32 to vector<1x512xf32>
    %97 = arith.mulf %27, %96 : vector<1x512xf32>
    %98 = arith.addf %94, %97 : vector<1x512xf32>
    %c10 = arith.constant 10 : index
    %99 = memref.load %arg4[%c10] : memref<16xf32, #tpu.memory_space<smem>>
    %100 = vector.broadcast %99 : f32 to vector<1x512xf32>
    %101 = arith.mulf %39, %100 : vector<1x512xf32>
    %102 = arith.addf %98, %101 : vector<1x512xf32>
    %c14 = arith.constant 14 : index
    %103 = memref.load %arg4[%c14] : memref<16xf32, #tpu.memory_space<smem>>
    %104 = vector.broadcast %103 : f32 to vector<1x512xf32>
    %105 = arith.mulf %51, %104 : vector<1x512xf32>
    %106 = arith.addf %102, %105 : vector<1x512xf32>
    %c2_23 = arith.constant 2 : index
    %107 = memref.load %arg5[%c2_23] : memref<4xf32, #tpu.memory_space<smem>>
    %108 = vector.broadcast %107 : f32 to vector<1x512xf32>
    %109 = arith.addf %106, %108 : vector<1x512xf32>
    %cst_24 = arith.constant 0.000000e+00 : f32
    %110 = vector.broadcast %cst_24 : f32 to vector<1x512xf32>
    %111 = arith.maximumf %109, %110 : vector<1x512xf32>
    %c3_25 = arith.constant 3 : index
    %112 = memref.load %arg4[%c3_25] : memref<16xf32, #tpu.memory_space<smem>>
    %113 = vector.broadcast %112 : f32 to vector<1x512xf32>
    %114 = arith.mulf %15, %113 : vector<1x512xf32>
    %c7_26 = arith.constant 7 : index
    %115 = memref.load %arg4[%c7_26] : memref<16xf32, #tpu.memory_space<smem>>
    %116 = vector.broadcast %115 : f32 to vector<1x512xf32>
    %117 = arith.mulf %27, %116 : vector<1x512xf32>
    %118 = arith.addf %114, %117 : vector<1x512xf32>
    %c11 = arith.constant 11 : index
    %119 = memref.load %arg4[%c11] : memref<16xf32, #tpu.memory_space<smem>>
    %120 = vector.broadcast %119 : f32 to vector<1x512xf32>
    %121 = arith.mulf %39, %120 : vector<1x512xf32>
    %122 = arith.addf %118, %121 : vector<1x512xf32>
    %c15 = arith.constant 15 : index
    %123 = memref.load %arg4[%c15] : memref<16xf32, #tpu.memory_space<smem>>
    %124 = vector.broadcast %123 : f32 to vector<1x512xf32>
    %125 = arith.mulf %51, %124 : vector<1x512xf32>
    %126 = arith.addf %122, %125 : vector<1x512xf32>
    %c3_27 = arith.constant 3 : index
    %127 = memref.load %arg5[%c3_27] : memref<4xf32, #tpu.memory_space<smem>>
    %128 = vector.broadcast %127 : f32 to vector<1x512xf32>
    %129 = arith.addf %126, %128 : vector<1x512xf32>
    %cst_28 = arith.constant 0.000000e+00 : f32
    %130 = vector.broadcast %cst_28 : f32 to vector<1x512xf32>
    %131 = arith.maximumf %129, %130 : vector<1x512xf32>
    %c0_29 = arith.constant 0 : index
    %132 = memref.load %arg6[%c0_29] : memref<4xf32, #tpu.memory_space<smem>>
    %133 = vector.broadcast %132 : f32 to vector<1x512xf32>
    %134 = arith.mulf %71, %133 : vector<1x512xf32>
    %c1_30 = arith.constant 1 : index
    %135 = memref.load %arg6[%c1_30] : memref<4xf32, #tpu.memory_space<smem>>
    %136 = vector.broadcast %135 : f32 to vector<1x512xf32>
    %137 = arith.mulf %91, %136 : vector<1x512xf32>
    %138 = arith.addf %134, %137 : vector<1x512xf32>
    %c2_31 = arith.constant 2 : index
    %139 = memref.load %arg6[%c2_31] : memref<4xf32, #tpu.memory_space<smem>>
    %140 = vector.broadcast %139 : f32 to vector<1x512xf32>
    %141 = arith.mulf %111, %140 : vector<1x512xf32>
    %142 = arith.addf %138, %141 : vector<1x512xf32>
    %c3_32 = arith.constant 3 : index
    %143 = memref.load %arg6[%c3_32] : memref<4xf32, #tpu.memory_space<smem>>
    %144 = vector.broadcast %143 : f32 to vector<1x512xf32>
    %145 = arith.mulf %131, %144 : vector<1x512xf32>
    %146 = arith.addf %142, %145 : vector<1x512xf32>
    %c0_33 = arith.constant 0 : index
    %147 = memref.load %arg7[%c0_33] : memref<1xf32, #tpu.memory_space<smem>>
    %148 = vector.broadcast %147 : f32 to vector<1x512xf32>
    %149 = arith.addf %146, %148 : vector<1x512xf32>
    %150 = arith.negf %149 : vector<1x512xf32>
    %151 = math.exp %150 : vector<1x512xf32>
    %cst_34 = arith.constant 1.000000e+00 : f32
    %152 = vector.broadcast %cst_34 : f32 to vector<1x512xf32>
    %153 = arith.addf %152, %151 : vector<1x512xf32>
    %154 = arith.divf %152, %153 : vector<1x512xf32>
    %c0_35 = arith.constant 0 : index
    %c0_36 = arith.constant 0 : index
    %155 = vector.load %arg9[%c0_35, %c0_36] : memref<1x512xf32, #tpu.memory_space<vmem>>, vector<1x512xf32>
    tpu.vector_store %arg9[%c0_35, %c0_36], %154 {strides = array<i32>} : memref<1x512xf32, #tpu.memory_space<vmem>>, vector<1x512xf32>,
    return
  }
  func.func @transform_0(%arg0: i32) -> i32 {
    %c0_i32 = arith.constant 0 : i32
    %c0_i32_0 = arith.constant 0 : i32
    return %c0_i32 : i32
  }
  func.func @transform_1(%arg0: i32) -> i32 {
    %c0_i32 = arith.constant 0 : i32
    %c0_i32_0 = arith.constant 0 : i32
    return %c0_i32 : i32
  }
  func.func @transform_2(%arg0: i32) -> i32 {
    %c0_i32 = arith.constant 0 : i32
    %c0_i32_0 = arith.constant 0 : i32
    return %c0_i32 : i32
  }
  func.func @transform_3(%arg0: i32) -> i32 {
    %c0_i32 = arith.constant 0 : i32
    %c0_i32_0 = arith.constant 0 : i32
    return %c0_i32 : i32
  }
  func.func @transform_4(%arg0: i32) -> i32 {
    %c0_i32 = arith.constant 0 : i32
    %c0_i32_0 = arith.constant 0 : i32
    return %c0_i32 : i32
  }
  func.func @transform_5(%arg0: i32) -> i32 {
    %c0_i32 = arith.constant 0 : i32
    %c0_i32_0 = arith.constant 0 : i32
    return %c0_i32 : i32
  }
  func.func @transform_6(%arg0: i32) -> i32 {
    %c0_i32 = arith.constant 0 : i32
    %c0_i32_0 = arith.constant 0 : i32
    return %c0_i32 : i32
  }
  func.func @transform_7(%arg0: i32) -> (i32, i32, i32) {
    %c0_i32 = arith.constant 0 : i32
    %c0_i32_0 = arith.constant 0 : i32
    %c0_i32_1 = arith.constant 0 : i32
    return %c0_i32, %arg0, %c0_i32_0 : i32, i32, i32
  }
  func.func @transform_8(%arg0: i32) -> (i32, i32) {
    %c0_i32 = arith.constant 0 : i32
    %c0_i32_0 = arith.constant 0 : i32
    return %arg0, %c0_i32 : i32, i32
  }
}

</mosaic_0001>

<bundles_post_ra>
// kernel: tpu_custom_call.1
= control target key start
LH: loop header
LB: loop body
LE: loop exit
PB: predicated region body
PF: predicated region fallthrough
CT: control target
= control target key end

     0   :  { %15 = vsyncpa [#allocation6], 0  ;;  %s567_s0 = inlined_call_operand.<no memory space> [shape: s32[1], index: 0, kind: input, shape index: {}]   ;;  %s568_s1 = inlined_call_operand.vmem [shape: f32[8], index: 1, kind: input, shape index: {}]   ;;  %s569_s2 = inlined_call_operand.vmem [shape: f32[4], index: 2, kind: input, shape index: {}]   ;;  %s570_s3 = inlined_call_operand.vmem [shape: f32[16], index: 3, kind: input, shape index: {}]   ;;  %s571_s4 = inlined_call_operand.vmem [shape: f32[4], index: 4, kind: input, shape index: {}]   ;;  %s572_s5 = inlined_call_operand.vmem [shape: f32[4], index: 5, kind: input, shape index: {}]   ;;  %s573_s6 = inlined_call_operand.<no memory space> [shape: f32[1], index: 6, kind: input, shape index: {}]   ;;  %s574_s7 = inlined_call_operand.vmem [shape: f32[2,1,512], index: 7, kind: input, shape index: {}]   ;;  %s575_s8 = inlined_call_operand.hbm [shape: f32[1,512], index: 8, kind: output, shape index: {}]  }
   0x1   :  { %16 = vsyncpa [#allocation8], 0 }
   0x2   :  { %17 = vsyncpa [#allocation11], 0  ;;  %s37_s28 = sshll.u32 %s569_s2, 4  ;;  %s38_s28 = int_to_ptr.vmem [resolvable:$true] %s37_s28 }
   0x3   :  { %18 = vsyncpa [#allocation5], 0  ;;  %s57_s9 = sshll.u32 %s571_s4, 4  ;;  %s303_s10 = scalar_lea.vmem %s38_s28, 16  ;;  %s58_s9 = int_to_ptr.vmem [resolvable:$true] %s57_s9 }
   0x4   :  { %p304_p0 = scmp.ne.s32.totalorder %s38_s28, %s303_s10  ;;  %p308_p1 = scmp.lt.s32.totalorder %s38_s28, %s38_s28 }
   0x5   :  { %p309_p2 = scmp.lt.s32.totalorder %s303_s10, %s303_s10 }
   0x7   :  { %p310_p3 = por %p309_p2, %p308_p1 }
   0x9   :  { %p311_p4 = pnand %p310_p3, %p304_p0 }
   0xb   :  { %314 = shalt.err (!%p311_p4)
}
   0xc   :  { %s393_s11 = smov [#allocation7]   ;;  %s315_s12 = scalar_lea.vmem %s58_s9, 16 }
   0xd   :  { %40 = dma.vmem_to_smem %s38_s28, 16, %s393_s11, [#allocation8]  }
   0xe   :  { %p316_p5 = scmp.ne.s32.totalorder %s58_s9, %s315_s12  ;;  %p320_p6 = scmp.lt.s32.totalorder %s58_s9, %s58_s9 }
   0xf   :  { %p321_p7 = scmp.lt.s32.totalorder %s315_s12, %s315_s12 }
  0x11   :  { %p322_p8 = por %p321_p7, %p320_p6 }
  0x13   :  { %p323_p9 = pnand %p322_p8, %p316_p5 }
  0x15   :  { %326 = shalt.err (!%p323_p9)
}
  0x16   :  { %s394_s2 = smov [#allocation10]   ;;  %s27_s14 = sshll.u32 %s568_s1, 4  ;;  %s28_s14 = int_to_ptr.vmem [resolvable:$true] %s27_s14 }
  0x17   :  { %60 = dma.vmem_to_smem %s58_s9, 16, %s394_s2, [#allocation11]  }
  0x18   :  { %s47_s17 = sshll.u32 %s570_s3, 4  ;;  %s327_s18 = scalar_lea.vmem %s28_s14, 16  ;;  %s48_s17 = int_to_ptr.vmem [resolvable:$true] %s47_s17 }
  0x19   :  { %p328_p10 = scmp.ne.s32.totalorder %s28_s14, %s327_s18  ;;  %p332_p11 = scmp.lt.s32.totalorder %s28_s14, %s28_s14 }
  0x1a   :  { %p333_p12 = scmp.lt.s32.totalorder %s327_s18, %s327_s18 }
  0x1c   :  { %p334_p13 = por %p333_p12, %p332_p11 }
  0x1e   :  { %p335_p0 = pnand %p334_p13, %p328_p10 }
  0x20   :  { %338 = shalt.err (!%p335_p0)
}
  0x21   :  { %s395_s19 = smov [#allocation4]   ;;  %s339_s20 = scalar_lea.vmem %s48_s17, 16 }
  0x22   :  { %30 = dma.vmem_to_smem %s28_s14, 16, %s395_s19, [#allocation6]  }
  0x23   :  { %p340_p1 = scmp.ne.s32.totalorder %s48_s17, %s339_s20  ;;  %p344_p2 = scmp.lt.s32.totalorder %s48_s17, %s48_s17 }
  0x24   :  { %p345_p3 = scmp.lt.s32.totalorder %s339_s20, %s339_s20 }
  0x26   :  { %p346_p4 = por %p345_p3, %p344_p2 }
  0x28   :  { %p347_p5 = pnand %p346_p4, %p340_p1 }
  0x2a   :  { %350 = shalt.err (!%p347_p5)
}
  0x2b   :  { %s396_s1 = smov [#allocation9]   ;;  %s67_s22 = sshll.u32 %s572_s5, 4  ;;  %s68_s22 = int_to_ptr.vmem [resolvable:$true] %s67_s22 }
  0x2c   :  { %50 = dma.vmem_to_smem %s48_s17, 16, %s396_s1, [#allocation8]  }
  0x2d   :  { %s351_s23 = scalar_lea.vmem %s68_s22, 16  ;;  %p356_p7 = scmp.lt.s32.totalorder %s68_s22, %s68_s22 }
  0x2e   :  { %p352_p6 = scmp.ne.s32.totalorder %s68_s22, %s351_s23  ;;  %p357_p8 = scmp.lt.s32.totalorder %s351_s23, %s351_s23 }
  0x30   :  { %p358_p9 = por %p357_p8, %p356_p7 }
  0x32   :  { %p359_p10 = pnand %p358_p9, %p352_p6 }
  0x34   :  { %362 = shalt.err (!%p359_p10)
}
  0x35   :  { %s397_s0 = smov [#allocation12]  }
  0x36   :  { %70 = dma.vmem_to_smem %s68_s22, 16, %s397_s0, [#allocation11]  }
  0x37   :  { %385 = dma.done.wait [#allocation6], 16  }
  0x38   :  { %386 = vsyncadd [#allocation6], 4294967280 }
  0x39   :  { %387 = dma.done.wait [#allocation8], 32  }
  0x3a   :  { %388 = vsyncadd [#allocation8], 4294967264 }
  0x3b   :  { %389 = dma.done.wait [#allocation11], 32  }
  0x3c   :  { %390 = vsyncadd [#allocation11], 4294967264 }
  0x3d   :  { %90 = sfence }
  0x3e   :  { %s94_s24 = sld [smem:[#allocation4]]  ;;  %s261_s25 = sld [smem:[#allocation4 + $0x4]]  ;;  %v91_v0 = vld [vmem:[%s574_s7] sm:$0xf]  ;;  %v260_v1 = vld [vmem:[%s574_s7 + $0x4] sm:$0xf] }
  0x3f   :  { %s459_s5 = sld [smem:[#allocation7]]  ;;  %s262_s26 = sld [smem:[#allocation4 + $0x1]] }
  0x40   :  { %s263_s27 = sld [smem:[#allocation4 + $0x5]]  ;;  %s461_s28 = sld [smem:[#allocation7 + $0x1]] }
  0x41   :  { %s265_s29 = sld [smem:[#allocation4 + $0x2]]  ;;  %s266_s10 = sld [smem:[#allocation4 + $0x6]] }
  0x42   :  { %s466_s11 = sld [smem:[#allocation7 + $0x2]]  ;;  %s471_s4 = sld [smem:[#allocation4 + $0x3]] }
  0x43   :  { %s473_s13 = sld [smem:[#allocation4 + $0x7]]  ;;  %s475_s14 = sld [smem:[#allocation7 + $0x3]] }
  0x44   :  { %v95_v2 = vstv %s94_s24  ;;  %s477_s15 = sld [smem:[#allocation9]]  ;;  %v98_v4 = vstv %s261_s25  ;;  %s479_s16 = sld [smem:[#allocation9 + $0x4]] }
  0x45   :  { %v96_v3 = vmul.f32 %v95_v2, %v91_v0  ;;  %s481_s17 = sld [smem:[#allocation9 + $0x8]]  ;;  %v99_v5 = vmul.f32 %v260_v1, %v98_v4  ;;  %v106_v6 = vstv %s262_s26  ;;  %s483_s7 = sld [smem:[#allocation9 + $0xc]]  ;;  %v102_v8 = vstv %s459_s5 }
  0x46   :  { %v109_v7 = vstv %s263_s27  ;;  %s485_s18 = sld [smem:[#allocation10]]  ;;  %v107_v9 = vmul.f32 %v106_v6, %v91_v0  ;;  %s488_s19 = sld [smem:[#allocation9 + $0x1]]  ;;  %v113_v13 = vstv %s461_s28 }
  0x47   :  { %v110_v10 = vmul.f32 %v260_v1, %v109_v7  ;;  %v117_v11 = vstv %s265_s29  ;;  %s490_s20 = sld [smem:[#allocation9 + $0x5]]  ;;  %v100_v12 = vadd.f32 %v99_v5, %v96_v3  ;;  %v120_v15 = vstv %s266_s10  ;;  %s493_s1 = sld [smem:[#allocation9 + $0x9]] }
  0x48   :  { %v118_v14 = vmul.f32 %v117_v11, %v91_v0  ;;  %s495_s3 = sld [smem:[#allocation9 + $0xd]]  ;;  %v121_v17 = vmul.f32 %v260_v1, %v120_v15  ;;  %v128_v18 = vstv %s471_s4  ;;  %s499_s21 = sld [smem:[#allocation9 + $0x2]]  ;;  %v124_v21 = vstv %s466_s11 }
  0x49   :  { %v111_v16 = vadd.f32 %v110_v10, %v107_v9  ;;  %v131_v19 = vstv %s473_s13  ;;  %v103_v20 = vadd.f32 %v102_v8, %v100_v12  ;;  %v129_v22 = vmul.f32 %v128_v18, %v91_v0  ;;  %s502_s22 = sld [smem:[#allocation9 + $0x6]]  ;;  %s506_s23 = sld [smem:[#allocation10 + $0x1]] }
  0x4a   :  { %v132_v23 = vmul.f32 %v260_v1, %v131_v19  ;;  %v122_v25 = vadd.f32 %v121_v17, %v118_v14  ;;  %v135_v26 = vstv %s475_s14  ;;  %v139_v27 = vstv %s477_s15  ;;  %s508_s0 = sld [smem:[#allocation9 + $0xa]]  ;;  %s512_s24 = sld [smem:[#allocation9 + $0xe]] }
  0x4b   :  { %v114_v24 = vadd.f32 %v113_v13, %v111_v16  ;;  %v104_v28 = vmax.f32 %v103_v20, 0.0  ;;  %v142_v30 = vstv %s479_s16  ;;  %v146_v31 = vstv %s481_s17  ;;  %s514_s25 = sld [smem:[#allocation9 + $0x3]]  ;;  %s518_s5 = sld [smem:[#allocation9 + $0x7]] }
  0x4c   :  { %v133_v29 = vadd.f32 %v132_v23, %v129_v22  ;;  %v125_v33 = vadd.f32 %v124_v21, %v122_v25  ;;  %v150_v34 = vstv %s483_s7  ;;  %v158_v35 = vstv %s488_s19  ;;  %s521_s26 = sld [smem:[#allocation9 + $0xb]]  ;;  %s523_s27 = sld [smem:[#allocation9 + $0xf]] }
  0x4d   :  { %v115_v32 = vmax.f32 %v114_v24, 0.0  ;;  %v140_v37 = vmul.f32 %v139_v27, %v104_v28  ;;  %v159_v38 = vmul.f32 %v158_v35, %v104_v28  ;;  %v161_v39 = vstv %s490_s20  ;;  %s529_s28 = sld [smem:[#allocation10 + $0x2]]  ;;  %s531_s29 = sld [smem:[#allocation12]] }
  0x4e   :  { %v136_v36 = vadd.f32 %v135_v26, %v133_v29  ;;  %v126_v40 = vmax.f32 %v125_v33, 0.0  ;;  %v165_v43 = vstv %s493_s1  ;;  %v154_v45 = vstv %s485_s18  ;;  %s534_s30 = sld [smem:[#allocation12 + $0x1]]  ;;  %s540_s9 = sld [smem:[#allocation10 + $0x3]] }
  0x4f   :  { %v143_v41 = vmul.f32 %v142_v30, %v115_v32  ;;  %v162_v42 = vmul.f32 %v161_v39, %v115_v32  ;;  %v169_v46 = vstv %s495_s3  ;;  %v177_v47 = vstv %s499_s21  ;;  %s542_s10 = sld [smem:[#allocation12 + $0x2]]  ;;  %s291_s11 = sld [smem:[#allocation12 + $0x3]] }
  0x50   :  { %v137_v44 = vmax.f32 %v136_v36, 0.0  ;;  %v147_v49 = vmul.f32 %v146_v31, %v126_v40  ;;  %v166_v51 = vmul.f32 %v165_v43, %v126_v40  ;;  %v178_v54 = vmul.f32 %v177_v47, %v104_v28  ;;  %s398_s4 = smov [#allocation13]  }
  0x51   :  { %v144_v48 = vadd.f32 %v143_v41, %v140_v37  ;;  %v163_v50 = vadd.f32 %v162_v42, %v159_v38  ;;  %v180_v55 = vstv %s502_s22  ;;  %v184_v59 = vstv %s508_s0  ;;  %s249_s13 = sshll.u32 %s398_s4, 4  ;;  %s250_s13 = int_to_ptr.vmem [resolvable:$true] %s249_s13 }
  0x52   :  { %v151_v52 = vmul.f32 %v150_v34, %v137_v44  ;;  %v170_v53 = vmul.f32 %v169_v46, %v137_v44  ;;  %v181_v58 = vmul.f32 %v180_v55, %v115_v32  ;;  %v173_v60 = vstv %s506_s23  ;;  %s363_s14 = scalar_lea.vmem %s250_s13, 64  ;;  %p368_p12 = scmp.lt.s32.totalorder %s250_s13, %s250_s13 }
  0x53   :  { %v148_v56 = vadd.f32 %v147_v49, %v144_v48  ;;  %v167_v57 = vadd.f32 %v166_v51, %v163_v50  ;;  %v185_v61 = vmul.f32 %v184_v59, %v126_v40  ;;  %v188_v62 = vstv %s512_s24  ;;  %p364_p11 = scmp.ne.s32.totalorder %s250_s13, %s363_s14  ;;  %p369_p13 = scmp.lt.s32.totalorder %s363_s14, %s363_s14 }
  0x54   :  { %v196_v63 = vstv %s514_s25  ;;  %v182_v2 = vadd.f32 %v181_v58, %v178_v54  ;;  %v189_v3 = vmul.f32 %v188_v62, %v137_v44  ;;  %v199_v5 = vstv %s518_s5 }
  0x55   :  { %v152_v0 = vadd.f32 %v151_v52, %v148_v56  ;;  %v171_v1 = vadd.f32 %v170_v53, %v167_v57  ;;  %v197_v4 = vmul.f32 %v196_v63, %v104_v28  ;;  %v203_v6 = vstv %s521_s26  ;;  %p370_p0 = por %p369_p13, %p368_p12 }
  0x56   :  { %v207_v7 = vstv %s523_s27  ;;  %v186_v10 = vadd.f32 %v185_v61, %v182_v2  ;;  %v200_v11 = vmul.f32 %v199_v5, %v115_v32  ;;  %v192_v12 = vstv %s529_s28 }
  0x57   :  { %v155_v8 = vadd.f32 %v154_v45, %v152_v0  ;;  %v174_v9 = vadd.f32 %v173_v60, %v171_v1  ;;  %v204_v13 = vmul.f32 %v203_v6, %v126_v40  ;;  %v208_v14 = vmul.f32 %v207_v7, %v137_v44  ;;  %p371_p1 = pnand %p370_p0, %p364_p11 }
  0x58   :  { %v215_v15 = vstv %s531_s29  ;;  %v190_v18 = vadd.f32 %v189_v3, %v186_v10  ;;  %v201_v19 = vadd.f32 %v200_v11, %v197_v4  ;;  %v218_v20 = vstv %s534_s30 }
  0x59   :  { %v156_v16 = vmax.f32 %v155_v8, 0.0  ;;  %v175_v17 = vmax.f32 %v174_v9, 0.0  ;;  %v211_v25 = vstv %s540_s9  ;;  %v222_v26 = vstv %s542_s10 }
  0x5a   :  { %v193_v21 = vadd.f32 %v192_v12, %v190_v18  ;;  %v205_v22 = vadd.f32 %v204_v13, %v201_v19  ;;  %v226_v32 = vstv %s291_s11  ;;  %v230_v36 = vstv %s573_s6 }
  0x5b   :  { %v216_v23 = vmul.f32 %v215_v15, %v156_v16  ;;  %v219_v24 = vmul.f32 %v218_v20, %v175_v17  ;;  %v238_v42 = vlaneseq }
  0x5c   :  { %v194_v27 = vmax.f32 %v193_v21, 0.0  ;;  %v209_v28 = vadd.f32 %v208_v14, %v205_v22 }
  0x5d   :  { %v220_v29 = vadd.f32 %v219_v24, %v216_v23  ;;  %vm240_vm0 = vcmp.lt.s32.totalorder %v238_v42, 512 }
  0x5e   :  { %v212_v30 = vadd.f32 %v211_v25, %v209_v28  ;;  %v223_v31 = vmul.f32 %v222_v26, %v194_v27 }
  0x60   :  { %v213_v33 = vmax.f32 %v212_v30, 0.0  ;;  %v224_v34 = vadd.f32 %v223_v31, %v220_v29 }
  0x62   :  { %v227_v35 = vmul.f32 %v226_v32, %v213_v33 }
  0x64   :  { %v228_v37 = vadd.f32 %v227_v35, %v224_v34 }
  0x66   :  { %v231_v38 = vadd.f32 %v230_v36, %v228_v37 }
  0x68   :  { %v292_v39 = vmul.f32 -1.442695, %v231_v38 }
  0x6a   :  { %299 = vpow2.f32 %v292_v39 }
  0x74   :  { %v300_v40 = vpop.eup %299 }
  0x75   :  { %v235_v41 = vadd.f32 1.0, %v300_v40 }
  0x77   :  { %301 = vrcp.f32 %v235_v41 }
  0x81   :  { %v302_v43 = vpop.eup %301 }
  0x82   :  { %242 = vst.msk [vmem:[#allocation13] sm:$0xf] %vm240_vm0, %v302_v43 }
  0x83   :  { %374 = shalt.err (!%p371_p1)
}
  0x84   :  { %s375_s16 = scalar_lea.hbm %s575_s8, 64 }
  0x85   :  { %p376_p2 = scmp.ne.s32.totalorder %s575_s8, %s375_s16  ;;  %p379_p3 = scmp.lt.u32.totalorder %s375_s16, %s575_s8 }
  0x87   :  { %p381_p4 = pnand %p379_p3, %p376_p2 }
  0x89   :  { %384 = shalt.err (!%p381_p4)
}
  0x8a   :  { %252 = dma.vmem_to_hbm [thread:$0]  %s250_s13, 64, %s575_s8, [#allocation5]  }
  0x8b   :  { %391 = dma.done.wait [#allocation5], 64  }
  0x8c   :  { %392 = vsyncadd [#allocation5], 4294967232 }
  0x8d   :  { %256 = vsyncpa [#allocation5], 1 }
  0x8e   :  { %257 = vsyncpa [#allocation6], 1 }
  0x8f   :  { %258 = vsyncpa [#allocation8], 1 }
  0x90   :  { %259 = vsyncpa [#allocation11], 1 }

</bundles_post_ra>
